<compile_context>
chip_gen: v5e
topology: v5e:2x2
jax: 0.10.0
libtpu: 0.0.40
codegen_flags: <defaults>
</compile_context>

<pallas_src>
import functools

import jax
import jax.numpy as jnp
from jax.experimental import pallas as pl
from jax.experimental.pallas import tpu as pltpu


def _latent_kernel(z_ref, e_ref, z_out_ref, loss_ref, *, use_mxu):
    # ---- tanh(z): elementwise, EUP handles the f32 tanh ----------------------
    mean = jnp.tanh(z_ref[...].astype(jnp.float32))            # (B, z_dim)
    z_out_ref[...] = mean.astype(z_out_ref.dtype)
    # NOTE: z_dim=32 < 128 lanes => masked vst; negligible at these sizes.

    e_dm = e_ref[...].astype(jnp.float32)                      # (z_dim, M), M on lanes
    inv_m = 1.0 / e_dm.shape[1]                                 # compile-time reciprocal

    # ---- pairwise squared distances (B, M) -----------------------------------
    if use_mxu:
        # Large-shape path: ||m||^2 + ||e||^2 - 2 m.e  via a single MXU matmul.
        # bf16 operands (v6e/v7x MXU peak rate), f32 accumulation; clamp the
        # cancellation-prone expansion at 0 (the min over B picks exactly the
        # near-zero entries).
        m_sq = jnp.sum(mean * mean, axis=1, keepdims=True)      # (B, 1)
        e_sq = jnp.sum(e_dm * e_dm, axis=0, keepdims=True)      # (1, M)
        cross = jnp.dot(mean.astype(jnp.bfloat16),
                        e_dm.astype(jnp.bfloat16),
                        preferred_element_type=jnp.float32)     # (B, M)
        dist = jnp.maximum(m_sq + e_sq - 2.0 * cross, 0.0)
    else:
        # Small-shape path: pure VPU broadcast-subtract, sublane reduce on XLU.
        diff = mean[:, :, None] - e_dm[None, :, :]               # (B, z_dim, M)
        dist = jnp.sum(diff * diff, axis=1)                      # (B, M)

    # min over batch axis (torch.min(distance, dim=0)), mean over M probes.
    # keepdims keeps everything in 2-D vreg layout; 1/M folds at compile time.
    dmin = jnp.min(dist, axis=0, keepdims=True)                  # (1, M)
    loss_ref[0, 0] = jnp.sum(dmin) * inv_m


def latent_layer_forward(data, *, M, key):
    """Pallas-backed equivalent of LatentLayer.forward.

    data['z'] : (B, z_dim) float32
    M         : number of random latent probes
    key       : jax.random key; supply a FRESH key per forward call (mirrors
                torch.rand drawing new probes every call).

    Returns a new dict with data['z'] = tanh(z), data['lse_loss'] = scalar loss,
    and data['_probes'] = the drawn probe matrix in (z_dim, M) layout
    (generated host-side; validation/debug only, never a kernel output).
    """
    z = data['z']
    B, z_dim = z.shape

    # Probes drawn outside the kernel, pre-transposed so M maps to lanes.
    e_dm = jax.random.uniform(key, (z_dim, M), dtype=jnp.float32,
                              minval=-1.0, maxval=1.0)

    # Byte-aware path selection: the VPU broadcast intermediate is
    # B*z_dim*M*4 bytes of live vregs/VMEM; switch to the MXU expansion well
    # before it stresses VMEM (v7x TC has only 64 MiB total).
    diff_bytes = B * z_dim * M * 4
    use_mxu = diff_bytes > (2 << 20)

    kernel = functools.partial(_latent_kernel, use_mxu=use_mxu)

    z_tanh, loss = pl.pallas_call(
        kernel,
        out_shape=(
            jax.ShapeDtypeStruct((B, z_dim), z.dtype),     # tanh(z)
            jax.ShapeDtypeStruct((1, 1), jnp.float32),     # scalar loss
        ),
        in_specs=[
            pl.BlockSpec(memory_space=pltpu.MemorySpace.VMEM),   # z
            pl.BlockSpec(memory_space=pltpu.MemorySpace.VMEM),   # e (z_dim, M)
        ],
        out_specs=(
            pl.BlockSpec(memory_space=pltpu.MemorySpace.VMEM),   # tanh(z)
            pl.BlockSpec(memory_space=pltpu.MemorySpace.SMEM),   # scalar loss
        ),
        # NOTE: under jit with donated args, add input_output_aliases={0: 0} to
        # reuse z's buffer for tanh(z); left off here so z stays readable for
        # the eager reference check below.
    )(z, e_dm)

    out = dict(data)
    out['z'] = z_tanh
    out['lse_loss'] = loss[0, 0]
    out['_probes'] = e_dm
    return out


if __name__ == "__main__":
    key = jax.random.PRNGKey(0)
    k_z, k_e = jax.random.split(key)
    B, z_dim, M = 8, 32, 16
    z = jax.random.normal(k_z, (B, z_dim), dtype=jnp.float32)
    data = {'z': z}

    out = latent_layer_forward(data, M=M, key=k_e)
    jax.block_until_ready(out['z'])
    jax.block_until_ready(out['lse_loss'])

    # ---- reference checks (plain JAX, same probes) ---------------------------
    mean_ref = jnp.tanh(z)
    e = out['_probes'].T                                           # (M, z_dim)
    assert e.shape == (M, z_dim), "probe shape mismatch"
    assert bool(jnp.all((e >= -1.0) & (e < 1.0))), "probes outside [-1, 1)"

    dist_ref = jnp.sum((mean_ref[:, None, :] - e[None, :, :]) ** 2, axis=2)
    loss_ref = jnp.mean(jnp.min(dist_ref, axis=0))

    assert jnp.allclose(out['z'], mean_ref, atol=1e-6), "tanh(z) mismatch"
    assert jnp.allclose(out['lse_loss'], loss_ref, atol=1e-5, rtol=1e-5), "loss mismatch"

    print("KERNEL_OK")
</pallas_src>

<mosaic_0001>
module attributes {stable_mosaic.version = 11 : i64} {
  func.func @_latent_kernel(%arg0: memref<8x32xf32, #tpu.memory_space<vmem>>, %arg1: memref<32x16xf32, #tpu.memory_space<vmem>>, %arg2: memref<8x32xf32, #tpu.memory_space<vmem>>, %arg3: memref<1x1xf32, #tpu.memory_space<smem>>) attributes {dimension_semantics = [], scalar_prefetch = 0 : i64, scratch_operands = 0 : i64, tpu.core_type = #tpu.core_type<tc>} {
    %c0 = arith.constant 0 : index
    %c0_0 = arith.constant 0 : index
    %0 = vector.load %arg0[%c0, %c0_0] : memref<8x32xf32, #tpu.memory_space<vmem>>, vector<8x32xf32>
    %1 = math.tanh %0 : vector<8x32xf32>
    %c0_1 = arith.constant 0 : index
    %c0_2 = arith.constant 0 : index
    %2 = vector.load %arg2[%c0_1, %c0_2] : memref<8x32xf32, #tpu.memory_space<vmem>>, vector<8x32xf32>
    tpu.vector_store %arg2[%c0_1, %c0_2], %1 {strides = array<i32>} : memref<8x32xf32, #tpu.memory_space<vmem>>, vector<8x32xf32>,
    %c0_3 = arith.constant 0 : index
    %c0_4 = arith.constant 0 : index
    %3 = vector.load %arg1[%c0_3, %c0_4] : memref<32x16xf32, #tpu.memory_space<vmem>>, vector<32x16xf32>
    %4 = vector.shape_cast %1 : vector<8x32xf32> to vector<8x32x1xf32>
    %5 = vector.shape_cast %3 : vector<32x16xf32> to vector<1x32x16xf32>
    %6 = vector.broadcast %4 : vector<8x32x1xf32> to vector<8x32x16xf32>
    %7 = vector.broadcast %5 : vector<1x32x16xf32> to vector<8x32x16xf32>
    %8 = arith.subf %6, %7 : vector<8x32x16xf32>
    %9 = arith.mulf %8, %8 : vector<8x32x16xf32>
    %cst = arith.constant dense<0.000000e+00> : vector<8x16xf32>
    %10 = vector.multi_reduction <add>, %9, %cst [1] : vector<8x32x16xf32> to vector<8x16xf32>
    %cst_5 = arith.constant dense<0x7F800000> : vector<16xf32>
    %11 = vector.multi_reduction <minimumf>, %10, %cst_5 [0] : vector<8x16xf32> to vector<16xf32>
    %12 = vector.shape_cast %11 : vector<16xf32> to vector<1x16xf32>
    %13 = vector.shape_cast %12 : vector<1x16xf32> to vector<1x1x16xf32>
    %cst_6 = arith.constant dense<0.000000e+00> : vector<1xf32>
    %14 = vector.multi_reduction <add>, %13, %cst_6 [1, 2] : vector<1x1x16xf32> to vector<1xf32>
    %15 = vector.shape_cast %14 : vector<1xf32> to vector<1x1x1xf32>
    %16 = vector.extract %15[0, 0, 0] : f32 from vector<1x1x1xf32>
    %cst_7 = arith.constant 6.250000e-02 : f32
    %17 = arith.mulf %16, %cst_7 : f32
    %c0_8 = arith.constant 0 : index
    %c0_9 = arith.constant 0 : index
    %18 = memref.load %arg3[%c0_8, %c0_9] : memref<1x1xf32, #tpu.memory_space<smem>>
    memref.store %17, %arg3[%c0_8, %c0_9] : memref<1x1xf32, #tpu.memory_space<smem>>
    return
  }
}

</mosaic_0001>

<bundles_post_ra>
// kernel: tpu_custom_call.1
= control target key start
LH: loop header
LB: loop body
LE: loop exit
PB: predicated region body
PF: predicated region fallthrough
CT: control target
= control target key end

     0   :  { %9 = vsyncpa [#allocation3], 0  ;;  %v24_v0 = vlaneseq  ;;  %s671_s0 = inlined_call_operand.vmem [shape: f32[8,32], index: 0, kind: input, shape index: {}]   ;;  %s672_s1 = inlined_call_operand.vmem [shape: f32[32,16], index: 1, kind: input, shape index: {}]   ;;  %s673_s2 = inlined_call_operand.hbm [shape: f32[8,32], index: 2, kind: output, shape index: {0}]   ;;  %s674_s3 = inlined_call_operand.hbm [shape: f32[1,1], index: 3, kind: output, shape index: {1}]  }
   0x1   :  { %v15_v1 = vld [vmem:[%s671_s0] sm:$0xff] }
   0x2   :  { %10 = vsyncpa [#allocation4], 0  ;;  %473 = vtanh.f32 %v15_v1  ;;  %v25_v2 = vshrl.u32 %v24_v0, 7  ;;  %v553_v16 = vld [vmem:[%s672_s1] sm:$0xff]  ;;  %v559_v18 = vld [vmem:[%s672_s1 + $0x8] sm:$0xff]  ;;  %vm287_vm0 = vcmask 130048  }
   0x3   :  { %v572_v30 = vld [vmem:[%s672_s1 + $0x10] sm:$0xff]  ;;  %v577_v31 = vld [vmem:[%s672_s1 + $0x18] sm:$0xff]  ;;  %vm407_vm1 = vcmask 122880   ;;  %s515_s1 = smov [#allocation2]   ;;  %s428_s24 = sshll.u32 %s673_s2, 4  ;;  %vm17_vm2 = vcmask 261120   ;;  %s429_s24 = int_to_ptr.hbm [resolvable:$true] %s428_s24 }
   0x4   :  { %457 = vset.pattern.permute.xlu2 %v25_v2  ;;  %456 = vset.pattern.permute.xlu0 %v25_v2  ;;  %v38_v3 = vadd.s32 16, %v25_v2  ;;  %v32_v7 = vadd.s32 8, %v25_v2  ;;  %v44_v9 = vadd.s32 24, %v25_v2  ;;  %s426_s21 = sshll.u32 %s515_s1, 4  ;;  %s437_s27 = sshll.u32 %s674_s3, 4  ;;  %s427_s21 = int_to_ptr.vmem [resolvable:$true] %s426_s21  ;;  %s438_s27 = int_to_ptr.hbm [resolvable:$true] %s437_s27 }
   0x5   :  { %s516_s30 = smov [#allocation5]  }
   0x6   :  { %458 = vset.pattern.permute.xlu1 %v38_v3 }
   0x8   :  { %v540_v4 = vpop.eup %473 }
   0x9   :  { %v48_v5 = vperm.slane %v540_v4, 1  ;;  %v23_v6 = vperm.slane %v540_v4, 0  ;;  %v98_v8 = vperm.slane %v540_v4, 3  ;;  %v73_v10 = vperm.slane %v540_v4, 2  ;;  %18 = vst.msk [vmem:[#allocation2] sm:$0xff] %vm17_vm2, %v540_v4 }
   0xa   :  { %v148_v11 = vperm.slane %v540_v4, 5  ;;  %v123_v12 = vperm.slane %v540_v4, 4  ;;  %v173_v13 = vperm.slane %v540_v4, 6  ;;  %v198_v14 = vperm.slane %v540_v4, 7  ;;  %431 = dma.vmem_to_hbm [thread:$0]  %s427_s21, 128, %s429_s24, [#allocation3]  }
   0xc   :  { %53 = vperm.xlu2 %457, %v48_v5   ;;  %28 = vperm.xlu0 %456, %v23_v6  }
   0xe   :  { %40 = vperm.xlu1 %458, %v23_v6  }
  0x14   :  { %461 = vset.pattern.permute.xlu2 %v32_v7  ;;  %103 = vperm.xlu0 %456, %v98_v8  }
  0x16   :  { %459 = vset.pattern.permute.xlu1 %v44_v9 }
  0x1c   :  { %59 = vperm.xlu2 %461, %v48_v5   ;;  %462 = vset.pattern.permute.xlu0 %v32_v7 }
  0x1e   :  { %46 = vperm.xlu1 %459, %v23_v6  }
  0x24   :  { %84 = vperm.xlu2 %461, %v73_v10   ;;  %34 = vperm.xlu0 %462, %v23_v6  }
  0x26   :  { %460 = vset.pattern.permute.xlu1 %v25_v2 }
  0x2c   :  { %464 = vset.pattern.permute.xlu2 %v25_v2  ;;  %159 = vperm.xlu0 %462, %v148_v11  }
  0x2e   :  { %78 = vperm.xlu1 %460, %v73_v10  }
  0x34   :  { %128 = vperm.xlu2 %464, %v123_v12   ;;  %467 = vset.pattern.permute.xlu0 %v38_v3 }
  0x36   :  { %463 = vset.pattern.permute.xlu1 %v32_v7 }
  0x3c   :  { %153 = vperm.xlu2 %464, %v148_v11   ;;  %65 = vperm.xlu0 %467, %v48_v5  }
  0x3e   :  { %109 = vperm.xlu1 %463, %v98_v8  }
  0x44   :  { %466 = vset.pattern.permute.xlu2 %v32_v7  ;;  %190 = vperm.xlu0 %467, %v173_v13  }
  0x46   :  { %134 = vperm.xlu1 %463, %v123_v12  }
  0x4c   :  { %184 = vperm.xlu2 %466, %v173_v13   ;;  %471 = vset.pattern.permute.xlu0 %v44_v9 }
  0x4e   :  { %465 = vset.pattern.permute.xlu1 %v25_v2 }
  0x54   :  { %209 = vperm.xlu2 %466, %v198_v14   ;;  %96 = vperm.xlu0 %471, %v73_v10  }
  0x56   :  { %178 = vperm.xlu1 %465, %v173_v13  }
  0x5c   :  { %469 = vset.pattern.permute.xlu2 %v38_v3  ;;  %221 = vperm.xlu0 %471, %v198_v14  }
  0x5e   :  { %203 = vperm.xlu1 %465, %v198_v14  }
  0x64   :  { %115 = vperm.xlu2 %469, %v98_v8  }
  0x66   :  { %468 = vset.pattern.permute.xlu1 %v38_v3  ;;  %v54_v15 = vpop.permute.xlu2 %53 }
  0x67   :  { %v227_v17 = vsub.f32 %v54_v15, %v553_v16 }
  0x69   :  { %v259_v19 = vmul.f32 %v227_v17, %v227_v17 }
  0x6b   :  { %v301_v22 = vsel %vm287_vm0, %v259_v19, 0.0 }
  0x6c   :  { %165 = vperm.xlu2 %469, %v148_v11  }
  0x6e   :  { %90 = vperm.xlu1 %468, %v73_v10  }
  0x74   :  { %470 = vset.pattern.permute.xlu2 %v44_v9 }
  0x76   :  { %140 = vperm.xlu1 %468, %v123_v12   ;;  %v60_v20 = vpop.permute.xlu2 %59 }
  0x77   :  { %v228_v21 = vsub.f32 %v60_v20, %v559_v18 }
  0x79   :  { %v260_v23 = vmul.f32 %v228_v21, %v228_v21 }
  0x7b   :  { %v302_v24 = vsel %vm287_vm0, %v260_v23, 0.0 }
  0x7c   :  { %71 = vperm.xlu2 %470, %v48_v5   ;;  %v564_v25 = vadd.f32 %v302_v24, %v301_v22 }
  0x7e   :  { %215 = vperm.xlu1 %468, %v198_v14   ;;  %v29_v26 = vpop.permute.xlu0 %28  ;;  %v85_v37 = vpop.permute.xlu2 %84 }
  0x7f   :  { %v223_v29 = vsub.f32 %v29_v26, %v553_v16  ;;  %v232_v46 = vsub.f32 %v85_v37, %v559_v18 }
  0x80   :  { %v41_v27 = vpop.permute.xlu1 %40 }
  0x81   :  { %v225_v33 = vsub.f32 %v41_v27, %v572_v30  ;;  %v255_v34 = vmul.f32 %v223_v29, %v223_v29  ;;  %v264_v51 = vmul.f32 %v232_v46, %v232_v46 }
  0x83   :  { %v257_v39 = vmul.f32 %v225_v33, %v225_v33  ;;  %v288_v40 = vsel %vm287_vm0, %v255_v34, 0.0  ;;  %v315_v55 = vsel %vm287_vm0, %v264_v51, 0.0 }
  0x84   :  { %146 = vperm.xlu2 %470, %v123_v12  }
  0x85   :  { %v291_v45 = vsel %vm287_vm0, %v257_v39, 0.0 }
  0x86   :  { %472 = vset.pattern.permute.xlu1 %v44_v9  ;;  %v566_v28 = vpop.permute.xlu0 %103 }
  0x87   :  { %v235_v34 = vsub.f32 %v566_v28, %v553_v16 }
  0x8c   :  { %196 = vperm.xlu2 %470, %v173_v13  }
  0x8e   :  { %121 = vperm.xlu1 %472, %v98_v8   ;;  %v129_v52 = vpop.permute.xlu2 %128 }
  0x8f   :  { %v239_v14 = vsub.f32 %v129_v52, %v553_v16 }
  0x90   :  { %v47_v32 = vpop.permute.xlu1 %46 }
  0x91   :  { %v226_v36 = vsub.f32 %v47_v32, %v577_v31  ;;  %v271_v24 = vmul.f32 %v239_v14, %v239_v14 }
  0x93   :  { %v258_v42 = vmul.f32 %v226_v36, %v226_v36  ;;  %v340_v28 = vsel %vm287_vm0, %v271_v24, 0.0 }
  0x95   :  { %v293_v48 = vsel %vm287_vm0, %v258_v42, 0.0 }
  0x96   :  { %171 = vperm.xlu1 %472, %v148_v11   ;;  %v35_v35 = vpop.permute.xlu0 %34  ;;  %v594_v58 = vpop.permute.xlu2 %153 }
  0x97   :  { %v224_v38 = vsub.f32 %v35_v35, %v559_v18 }
  0x99   :  { %v256_v41 = vmul.f32 %v224_v38, %v224_v38 }
  0x9b   :  { %v289_v43 = vsel %vm287_vm0, %v256_v41, 0.0 }
  0x9c   :  { %v290_v44 = vadd.f32 %v289_v43, %v288_v40 }
  0x9e   :  { %v292_v47 = vadd.f32 %v291_v45, %v290_v44  ;;  %v596_v0 = vpop.permute.xlu0 %159 }
  0xa0   :  { %v587_v49 = vadd.f32 %v293_v48, %v292_v47  ;;  %v79_v50 = vpop.permute.xlu1 %78 }
  0xa1   :  { %v231_v53 = vsub.f32 %v79_v50, %v553_v16 }
  0xa3   :  { %v263_v54 = vmul.f32 %v231_v53, %v231_v53 }
  0xa5   :  { %v314_v56 = vsel %vm287_vm0, %v263_v54, 0.0 }
  0xa6   :  { %v592_v57 = vadd.f32 %v315_v55, %v314_v56  ;;  %v185_v59 = vpop.permute.xlu2 %184 }
  0xa7   :  { %v248_v12 = vsub.f32 %v185_v59, %v559_v18 }
  0xa9   :  { %v280_v19 = vmul.f32 %v248_v12, %v248_v12 }
  0xab   :  { %v367_v38 = vsel %vm287_vm0, %v280_v19, 0.0 }
  0xae   :  { %v210_v61 = vpop.permute.xlu2 %209  ;;  %v66_v3 = vpop.permute.xlu0 %65 }
  0xaf   :  { %v252_v20 = vsub.f32 %v210_v61, %v559_v18  ;;  %v229_v26 = vsub.f32 %v66_v3, %v572_v30 }
  0xb0   :  { %v110_v60 = vpop.permute.xlu1 %109 }
  0xb1   :  { %v284_v39 = vmul.f32 %v252_v20, %v252_v20  ;;  %v261_v46 = vmul.f32 %v229_v26, %v229_v26  ;;  %v236_v54 = vsub.f32 %v110_v60, %v559_v18 }
  0xb3   :  { %v380_v55 = vsel %vm287_vm0, %v284_v39, 0.0  ;;  %v304_v12 = vsel %vm287_vm0, %v261_v46, 0.0 }
  0xb6   :  { %v191_v7 = vpop.permute.xlu0 %190 }
  0xb7   :  { %v249_v29 = vsub.f32 %v191_v7, %v572_v30 }
  0xb8   :  { %v135_v62 = vpop.permute.xlu1 %134 }
  0xb9   :  { %v240_v15 = vsub.f32 %v135_v62, %v559_v18  ;;  %v281_v48 = vmul.f32 %v249_v29, %v249_v29 }
  0xbb   :  { %v272_v27 = vmul.f32 %v240_v15, %v240_v15 }
  0xbd   :  { %v341_v47 = vsel %vm287_vm0, %v272_v27, 0.0  ;;  %v305_v27 = vadd.f32 %v304_v12, %v564_v25 }
  0xbe   :  { %v116_v63 = vpop.permute.xlu2 %115  ;;  %v342_v7 = vadd.f32 %v341_v47, %v340_v28 }
  0xc6   :  { %v598_v2 = vpop.permute.xlu2 %165  ;;  %v97_v10 = vpop.permute.xlu0 %96 }
  0xc7   :  { %v234_v53 = vsub.f32 %v97_v10, %v577_v31  ;;  %v245_v25 = vsub.f32 %v598_v2, %v572_v30 }
  0xc8   :  { %v179_v1 = vpop.permute.xlu1 %178 }
  0xc9   :  { %v247_v13 = vsub.f32 %v179_v1, %v553_v16  ;;  %v277_v47 = vmul.f32 %v245_v25, %v245_v25 }
  0xcb   :  { %v279_v21 = vmul.f32 %v247_v13, %v247_v13 }
  0xcd   :  { %v366_v40 = vsel %vm287_vm0, %v279_v21, 0.0 }
  0xce   :  { %v222_v33 = vpop.permute.xlu0 %221  ;;  %v368_v56 = vadd.f32 %v367_v38, %v366_v40 }
  0xcf   :  { %v254_v45 = vsub.f32 %v222_v33, %v577_v31 }
  0xd0   :  { %v204_v5 = vpop.permute.xlu1 %203 }
  0xd1   :  { %v251_v17 = vsub.f32 %v204_v5, %v553_v16  ;;  %v286_v3 = vmul.f32 %v254_v45, %v254_v45  ;;  %v267_v5 = vmul.f32 %v235_v34, %v235_v34  ;;  %v243_v34 = vsub.f32 %v594_v58, %v553_v16 }
  0xd2   :  { %v295_v16 = vrot.slane %v587_v49, 4 }
  0xd3   :  { %v283_v35 = vmul.f32 %v251_v17, %v251_v17  ;;  %v268_v17 = vmul.f32 %v236_v54, %v236_v54  ;;  %v384_v21 = vsel %vm287_vm0, %v286_v3, 0.0  ;;  %v327_v33 = vsel %vm287_vm0, %v267_v5, 0.0 }
  0xd4   :  { %v275_v58 = vmul.f32 %v243_v34, %v243_v34 }
  0xd5   :  { %v379_v50 = vsel %vm287_vm0, %v283_v35, 0.0  ;;  %v244_v35 = vsub.f32 %v596_v0, %v559_v18 }
  0xd6   :  { %v72_v6 = vpop.permute.xlu2 %71 }
  0xd7   :  { %v230_v51 = vsub.f32 %v72_v6, %v577_v31  ;;  %v381_v6 = vadd.f32 %v380_v55, %v379_v50  ;;  %v276_v18 = vmul.f32 %v244_v35, %v244_v35 }
  0xd9   :  { %v262_v10 = vmul.f32 %v230_v51, %v230_v51  ;;  %v354_v54 = vsel %vm287_vm0, %v276_v18, 0.0 }
  0xde   :  { %v147_v9 = vpop.permute.xlu2 %146 }
  0xdf   :  { %v242_v42 = vsub.f32 %v147_v9, %v577_v31  ;;  %v237_v9 = vsub.f32 %v116_v63, %v572_v30  ;;  %v306_v63 = vsel %vm287_vm0, %v262_v10, 0.0 }
  0xe0   :  { %v91_v8 = vpop.permute.xlu1 %90 }
  0xe1   :  { %v233_v36 = vsub.f32 %v91_v8, %v572_v30  ;;  %v274_v61 = vmul.f32 %v242_v42, %v242_v42  ;;  %v369_v8 = vsel %vm287_vm0, %v281_v48, 0.0 }
  0xe2   :  { %v370_v19 = vadd.f32 %v369_v8, %v368_v56 }
  0xe3   :  { %v265_v52 = vmul.f32 %v233_v36, %v233_v36  ;;  %v345_v20 = vsel %vm287_vm0, %v274_v61, 0.0  ;;  %v307_v36 = vadd.f32 %v306_v63, %v305_v27 }
  0xe5   :  { %v317_v60 = vsel %vm287_vm0, %v265_v52, 0.0  ;;  %v308_v28 = vrot.slane %v307_v36, 4  ;;  %v296_v52 = vadd.f32 %v295_v16, %v587_v49 }
  0xe6   :  { %v197_v22 = vpop.permute.xlu2 %196 }
  0xe7   :  { %v250_v41 = vsub.f32 %v197_v22, %v577_v31  ;;  %v318_v22 = vadd.f32 %v317_v60, %v592_v57  ;;  %v328_v57 = vsel %vm287_vm0, %v268_v17, 0.0  ;;  %v309_v55 = vadd.f32 %v308_v28, %v307_v36 }
  0xe8   :  { %v141_v11 = vpop.permute.xlu1 %140  ;;  %v329_v42 = vadd.f32 %v328_v57, %v327_v33 }
  0xe9   :  { %v241_v23 = vsub.f32 %v141_v11, %v572_v30  ;;  %v282_v59 = vmul.f32 %v250_v41, %v250_v41  ;;  %v266_v11 = vmul.f32 %v234_v53, %v234_v53  ;;  %v353_v53 = vsel %vm287_vm0, %v275_v58, 0.0 }
  0xea   :  { %v355_v5 = vadd.f32 %v354_v54, %v353_v53  ;;  %v310_v60 = vrot.slane %v309_v55, 2 }
  0xeb   :  { %v273_v43 = vmul.f32 %v241_v23, %v241_v23  ;;  %v371_v13 = vsel %vm287_vm0, %v282_v59, 0.0  ;;  %v269_v23 = vmul.f32 %v237_v9, %v237_v9  ;;  %v319_v24 = vsel %vm287_vm0, %v266_v11, 0.0 }
  0xec   :  { %v372_v26 = vadd.f32 %v371_v13, %v370_v19  ;;  %v297_v9 = vrot.slane %v296_v52, 2 }
  0xed   :  { %v343_v62 = vsel %vm287_vm0, %v273_v43, 0.0  ;;  %v330_v39 = vsel %vm287_vm0, %v269_v23, 0.0 }
  0xee   :  { %v344_v14 = vadd.f32 %v343_v62, %v342_v7  ;;  %v373_v40 = vrot.slane %v372_v26, 4  ;;  %v331_v45 = vadd.f32 %v330_v39, %v329_v42  ;;  %v356_v62 = vsel %vm287_vm0, %v277_v47, 0.0 }
  0xef   :  { %v357_v49 = vadd.f32 %v356_v62, %v355_v5 }
  0xf0   :  { %v216_v32 = vpop.permute.xlu1 %215  ;;  %v346_v29 = vadd.f32 %v345_v20, %v344_v14  ;;  %v374_v48 = vadd.f32 %v373_v40, %v372_v26 }
  0xf1   :  { %v253_v37 = vsub.f32 %v216_v32, %v572_v30 }
  0xf2   :  { %v347_v43 = vrot.slane %v346_v29, 4 }
  0xf3   :  { %v285_v44 = vmul.f32 %v253_v37, %v253_v37  ;;  %v320_v37 = vadd.f32 %v319_v24, %v318_v22  ;;  %v311_v22 = vadd.f32 %v310_v60, %v309_v55 }
  0xf4   :  { %v348_v51 = vadd.f32 %v347_v43, %v346_v29 }
  0xf5   :  { %v382_v1 = vsel %vm287_vm0, %v285_v44, 0.0  ;;  %v321_v46 = vrot.slane %v320_v37, 4  ;;  %v312_v33 = vrot.slane %v311_v22, 1 }
  0xf6   :  { %v383_v15 = vadd.f32 %v382_v1, %v381_v6  ;;  %v375_v1 = vrot.slane %v374_v48, 2  ;;  %v349_v7 = vrot.slane %v348_v51, 2 }
  0xf7   :  { %v322_v56 = vadd.f32 %v321_v46, %v320_v37 }
  0xf8   :  { %v385_v32 = vadd.f32 %v384_v21, %v383_v15  ;;  %v376_v13 = vadd.f32 %v375_v1, %v374_v48  ;;  %v350_v15 = vadd.f32 %v349_v7, %v348_v51  ;;  %v298_v21 = vadd.f32 %v297_v9, %v296_v52 }
  0xf9   :  { %v323_v11 = vrot.slane %v322_v56, 2 }
  0xfa   :  { %v386_v44 = vrot.slane %v385_v32, 4  ;;  %v377_v24 = vrot.slane %v376_v13, 1  ;;  %v351_v29 = vrot.slane %v350_v15, 1 }
  0xfc   :  { %v387_v30 = vadd.f32 %v386_v44, %v385_v32  ;;  %v299_v32 = vrot.slane %v298_v21, 1  ;;  %v352_v37 = vadd.f32 %v351_v29, %v350_v15 }
  0xfe   :  { %v388_v8 = vrot.slane %v387_v30, 2  ;;  %v300_v25 = vadd.f32 %v299_v32, %v298_v21  ;;  %v396_v16 = vsel %vm287_vm0, %v352_v37, inf }
 0x100   :  { %v122_v38 = vpop.permute.xlu1 %121  ;;  %v389_v17 = vadd.f32 %v388_v8, %v387_v30 }
 0x101   :  { %v238_v41 = vsub.f32 %v122_v38, %v577_v31  ;;  %v378_v38 = vadd.f32 %v377_v24, %v376_v13 }
 0x102   :  { %v390_v26 = vrot.slane %v389_v17, 1 }
 0x103   :  { %v270_v0 = vmul.f32 %v238_v41, %v238_v41  ;;  %v313_v41 = vadd.f32 %v312_v33, %v311_v22  ;;  %v400_v58 = vsel %vm287_vm0, %v378_v38, inf }
 0x104   :  { %v391_v39 = vadd.f32 %v390_v26, %v389_v17 }
 0x105   :  { %v332_v50 = vsel %vm287_vm0, %v270_v0, 0.0  ;;  %v393_v28 = vsel %vm287_vm0, %v313_v41, inf }
 0x106   :  { %v333_v2 = vadd.f32 %v332_v50, %v331_v45  ;;  %v402_v18 = vsel %vm287_vm0, %v391_v39, inf  ;;  %v392_v45 = vsel %vm287_vm0, %v300_v25, inf }
 0x107   :  { %v397_v48 = vmin.f32 %v392_v45, %v396_v16 }
 0x108   :  { %v334_v59 = vrot.slane %v333_v2, 4  ;;  %v172_v61 = vpop.permute.xlu1 %171 }
 0x109   :  { %v246_v3 = vsub.f32 %v172_v61, %v577_v31  ;;  %v324_v31 = vadd.f32 %v323_v11, %v322_v56 }
 0x10a   :  { %v335_v6 = vadd.f32 %v334_v59, %v333_v2 }
 0x10b   :  { %v278_v10 = vmul.f32 %v246_v3, %v246_v3  ;;  %v325_v34 = vrot.slane %v324_v31, 1 }
 0x10c   :  { %v336_v12 = vrot.slane %v335_v6, 2 }
 0x10d   :  { %v358_v14 = vsel %vm287_vm0, %v278_v10, 0.0  ;;  %v326_v42 = vadd.f32 %v325_v34, %v324_v31 }
 0x10e   :  { %v337_v19 = vadd.f32 %v336_v12, %v335_v6  ;;  %v359_v20 = vadd.f32 %v358_v14, %v357_v49 }
 0x10f   :  { %v394_v46 = vsel %vm287_vm0, %v326_v42, inf }
 0x110   :  { %v338_v23 = vrot.slane %v337_v19, 1  ;;  %v360_v63 = vrot.slane %v359_v20, 4  ;;  %v401_v51 = vmin.f32 %v394_v46, %v400_v58 }
 0x112   :  { %v361_v27 = vadd.f32 %v360_v63, %v359_v20  ;;  %v339_v57 = vadd.f32 %v338_v23, %v337_v19 }
 0x114   :  { %v362_v35 = vrot.slane %v361_v27, 2  ;;  %v395_v43 = vsel %vm287_vm0, %v339_v57, inf }
 0x115   :  { %v403_v0 = vmin.f32 %v395_v43, %v402_v18 }
 0x116   :  { %v363_v36 = vadd.f32 %v362_v35, %v361_v27 }
 0x117   :  { %v405_v2 = vmin.f32 %v401_v51, %v403_v0 }
 0x118   :  { %v364_v40 = vrot.slane %v363_v36, 1 }
 0x11a   :  { %v365_v44 = vadd.f32 %v364_v40, %v363_v36 }
 0x11c   :  { %v398_v47 = vsel %vm287_vm0, %v365_v44, inf }
 0x11d   :  { %v399_v50 = vmin.f32 %v393_v28, %v398_v47 }
 0x11f   :  { %v404_v30 = vmin.f32 %v397_v48, %v399_v50 }
 0x121   :  { %v406_v52 = vmin.f32 %v404_v30, %v405_v2 }
 0x123   :  { %v408_v53 = vsel %vm407_vm1, %v406_v52, 0.0 }
 0x124   :  { %409 = vadd.xlane.f32.xlu1 %v408_v53 }
 0x197   :  { %v410_v54 = vpop.xlane.xlu1 %409 }
 0x198   :  { %v411_v55 = vrot.slane %v410_v54, 4 }
 0x19a   :  { %v412_v56 = vadd.f32 %v411_v55, %v410_v54 }
 0x19c   :  { %v413_v59 = vrot.slane %v412_v56, 2 }
 0x19e   :  { %v414_v61 = vadd.f32 %v413_v59, %v412_v56 }
 0x1a0   :  { %v415_v62 = vrot.slane %v414_v61, 1 }
 0x1a2   :  { %v416_v1 = vadd.f32 %v415_v62, %v414_v61 }
 0x1a4   :  { %452 = vpush %v416_v1 }
 0x1d5   :  { %s453_s28 = spop %452 }
 0x1d6   :  { %s418_s29 = smul.f32 0.0625, %s453_s28 }
 0x1d8   :  { %420 = sst [smem:[#allocation5]] %s418_s29 }
 0x1d9   :  { %440 = dma.smem_to_hbm %s516_s30, 16, %s438_s27, [#allocation4]  }
 0x1da   :  { %511 = dma.done.wait [#allocation3], 128  }
 0x1db   :  { %512 = vsyncadd [#allocation3], 4294967168 }
 0x1dc   :  { %513 = dma.done.wait [#allocation4], 16  }
 0x1dd   :  { %514 = vsyncadd [#allocation4], 4294967280 }
 0x1de   :  { %449 = sfence }
 0x1df   :  { %450 = vsyncpa [#allocation3], 1 }
 0x1e0   :  { %451 = vsyncpa [#allocation4], 1 }

</bundles_post_ra>
